<compile_context>
chip_gen: v7x
topology: tpu7x:2x2x1
jax: 0.10.0
libtpu: 0.0.40
codegen_flags: <defaults>
</compile_context>

<pallas_src>
from functools import partial
from typing import NamedTuple

import jax
import jax.numpy as jnp
from jax.experimental import pallas as pl
from jax.experimental.pallas import tpu as pltpu  # noqa: F401  (TPU backend)

_EPS = 1e-5
_NEG_SLOPE = 0.01   # nn.LeakyReLU default
_LANE = 128         # padded lane width for every slab segment / the output


def _round_up(n, m):
    return ((n + m - 1) // m) * m


def _leaky_relu(x):
    # mul + max: cheaper than cmp + mul + select.
    return jnp.maximum(x, _NEG_SLOPE * x)


class SlabLayout(NamedTuple):
    """Static (hashable) description of where each segment lives in the slab."""
    num_feature: int
    r_w1: int
    r_b1: int
    r_w2: int
    r_b2: int
    r_w3: int
    r_b3: int
    num_class: int


def _make_kernel(layout: SlabLayout):
    F = layout.num_feature
    r_w1, r_b1 = layout.r_w1, layout.r_b1
    r_w2, r_b2 = layout.r_w2, layout.r_b2
    r_w3, r_b3 = layout.r_w3, layout.r_b3

    def kernel(x_ref, p_ref, out_ref):
        x = x_ref[...].astype(jnp.float32)                       # [B, F]

        # layer_1 (+ folded batchnorm1) + LeakyReLU   (padded width = 128)
        w1 = p_ref[r_w1:r_w1 + F, :]                             # [F, 128]
        b1 = p_ref[r_b1:r_b1 + 1, :]                             # [1, 128]
        h = jnp.dot(x, w1, preferred_element_type=jnp.float32) + b1
        h = _leaky_relu(h)

        # layer_2 (+ folded batchnorm2) + LeakyReLU
        w2 = p_ref[r_w2:r_w2 + _LANE, :]                         # [128, 128]
        b2 = p_ref[r_b2:r_b2 + 1, :]                             # [1, 128]
        h = jnp.dot(h, w2, preferred_element_type=jnp.float32) + b2
        h = _leaky_relu(h)

        # dropout (eval mode) == identity

        # layer_out (padded to 128 output lanes; lanes >= num_class are zero)
        w3 = p_ref[r_w3:r_w3 + _LANE, :]                         # [128, 128]
        b3 = p_ref[r_b3:r_b3 + 1, :]                             # [1, 128]
        out = jnp.dot(h, w3, preferred_element_type=jnp.float32) + b3
        out_ref[...] = out.astype(out_ref.dtype)

    return kernel


def prepare_params(params):
    """One-time host-side prep (call ONCE, outside the jitted forward).

    Folds eval-mode BatchNorm into the preceding Linear, transposes weights to
    [in, out], zero-pads every hidden/output width to 128 lanes, and packs all
    six tensors into a single [rows, 128] f32 slab with 8-row-aligned segment
    starts. Returns (slab, layout).
    """
    w1_t = params["w1"].T                                   # [F, H1]
    F, H1 = w1_t.shape
    H2 = params["w2"].shape[0]
    C = params["w3"].shape[0]
    assert H1 <= _LANE and H2 <= _LANE and C <= _LANE, (
        "single-block kernel supports hidden/output widths <= 128")

    s1 = params["bn1_gamma"] * jax.lax.rsqrt(params["bn1_var"] + _EPS)
    s2 = params["bn2_gamma"] * jax.lax.rsqrt(params["bn2_var"] + _EPS)

    w1f = w1_t * s1[None, :]                                            # [F, H1]
    b1f = (params["b1"] - params["bn1_mean"]) * s1 + params["bn1_beta"]  # [H1]
    w2f = params["w2"].T * s2[None, :]                                   # [H1, H2]
    b2f = (params["b2"] - params["bn2_mean"]) * s2 + params["bn2_beta"]  # [H2]
    w3f = params["w3"].T                                                 # [H2, C]
    b3f = params["b3"]                                                   # [C]

    # 8-row-aligned segment offsets inside the slab.
    r_w1 = 0
    r_b1 = _round_up(F, 8)
    r_w2 = r_b1 + 8
    r_b2 = r_w2 + _LANE
    r_w3 = r_b2 + 8
    r_b3 = r_w3 + _LANE
    n_rows = r_b3 + 8

    slab = jnp.zeros((n_rows, _LANE), jnp.float32)
    slab = slab.at[r_w1:r_w1 + F, :H1].set(w1f)
    slab = slab.at[r_b1, :H1].set(b1f)
    slab = slab.at[r_w2:r_w2 + H1, :H2].set(w2f)
    slab = slab.at[r_b2, :H2].set(b2f)
    slab = slab.at[r_w3:r_w3 + H2, :C].set(w3f)
    slab = slab.at[r_b3, :C].set(b3f)

    layout = SlabLayout(F, r_w1, r_b1, r_w2, r_b2, r_w3, r_b3, C)
    return slab, layout


def _full_block(shape):
    # Helper avoids the Python late-binding trap of closing over a loop var.
    ndim = len(shape)
    return pl.BlockSpec(shape, lambda: (0,) * ndim)


@partial(jax.jit, static_argnames=("layout",))
def multiclass_classification_forward(x, param_slab, *, layout):
    """x: [batch, num_feature] float32. param_slab/layout from prepare_params()."""
    batch = x.shape[0]

    out_padded = pl.pallas_call(
        _make_kernel(layout),
        out_shape=jax.ShapeDtypeStruct((batch, _LANE), jnp.float32),
        grid=(),                       # tiny, latency-bound: single invocation
        in_specs=[_full_block(x.shape), _full_block(param_slab.shape)],
        out_specs=pl.BlockSpec((batch, _LANE), lambda: (0, 0)),
    )(x, param_slab)

    return out_padded[:, :layout.num_class]


def init_params(key, num_feature, num_class, num_hidden1, num_hidden2):
    ks = jax.random.split(key, 12)

    def linear(kw, kb, fan_in, fan_out):
        bound = 1.0 / jnp.sqrt(fan_in)
        w = jax.random.uniform(kw, (fan_out, fan_in), jnp.float32, -bound, bound)
        b = jax.random.uniform(kb, (fan_out,), jnp.float32, -bound, bound)
        return w, b

    w1, b1 = linear(ks[0], ks[1], num_feature, num_hidden1)
    w2, b2 = linear(ks[2], ks[3], num_hidden1, num_hidden2)
    w3, b3 = linear(ks[4], ks[5], num_hidden2, num_class)

    params = dict(
        w1=w1, b1=b1, w2=w2, b2=b2, w3=w3, b3=b3,
        # BatchNorm1d affine + (non-trivial, deterministic) running stats.
        bn1_gamma=1.0 + 0.1 * jax.random.normal(ks[6], (num_hidden1,), jnp.float32),
        bn1_beta=0.1 * jax.random.normal(ks[7], (num_hidden1,), jnp.float32),
        bn1_mean=0.05 * jax.random.normal(ks[8], (num_hidden1,), jnp.float32),
        bn1_var=1.0 + 0.1 * jax.random.uniform(ks[9], (num_hidden1,), jnp.float32),
        bn2_gamma=1.0 + 0.1 * jax.random.normal(ks[10], (num_hidden2,), jnp.float32),
        bn2_beta=0.1 * jax.random.normal(ks[11], (num_hidden2,), jnp.float32),
        bn2_mean=jnp.zeros((num_hidden2,), jnp.float32),
        bn2_var=jnp.ones((num_hidden2,), jnp.float32),
    )
    return params


def _reference_forward(x, params):
    """Pure-JAX reference (eval-mode, unfolded BN) for a sanity check."""
    h = x @ params["w1"].T + params["b1"]
    h = (h - params["bn1_mean"]) * (params["bn1_gamma"] *
        jax.lax.rsqrt(params["bn1_var"] + _EPS)) + params["bn1_beta"]
    h = jnp.where(h >= 0, h, _NEG_SLOPE * h)
    h = h @ params["w2"].T + params["b2"]
    h = (h - params["bn2_mean"]) * (params["bn2_gamma"] *
        jax.lax.rsqrt(params["bn2_var"] + _EPS)) + params["bn2_beta"]
    h = jnp.where(h >= 0, h, _NEG_SLOPE * h)
    return h @ params["w3"].T + params["b3"]


if __name__ == "__main__":
    key = jax.random.PRNGKey(0)
    k_x, k_p = jax.random.split(key)

    batch, num_feature, num_hidden1, num_hidden2, num_class = 16, 32, 64, 64, 8

    x = jax.random.normal(k_x, (batch, num_feature), jnp.float32)
    params = init_params(k_p, num_feature, num_class, num_hidden1, num_hidden2)

    # One-time prep (BN folding + transposes + padding + slab packing),
    # outside the jitted forward.
    slab, layout = prepare_params(params)
    slab = jax.block_until_ready(slab)

    out = multiclass_classification_forward(x, slab, layout=layout)
    out = jax.block_until_ready(out)

    ref = _reference_forward(x, params)
    assert out.shape == (batch, num_class)
    assert jnp.allclose(out, ref, atol=1e-4, rtol=1e-4)

    print("KERNEL_OK")
</pallas_src>

<mosaic_0001>
module attributes {stable_mosaic.version = 11 : i64} {
  func.func @kernel(%arg0: memref<16x32xf32, #tpu.memory_space<vmem>>, %arg1: memref<312x128xf32, #tpu.memory_space<vmem>>, %arg2: memref<16x128xf32, #tpu.memory_space<vmem>>) attributes {dimension_semantics = [], scalar_prefetch = 0 : i64, scratch_operands = 0 : i64, tpu.core_type = #tpu.core_type<tc>} {
    %c0 = arith.constant 0 : index
    %c0_0 = arith.constant 0 : index
    %0 = vector.load %arg0[%c0, %c0_0] : memref<16x32xf32, #tpu.memory_space<vmem>>, vector<16x32xf32>
    %c0_1 = arith.constant 0 : index
    %c0_2 = arith.constant 0 : index
    %1 = vector.load %arg1[%c0_1, %c0_2] : memref<312x128xf32, #tpu.memory_space<vmem>>, vector<32x128xf32>
    %c32 = arith.constant 32 : index
    %c0_3 = arith.constant 0 : index
    %2 = vector.load %arg1[%c32, %c0_3] : memref<312x128xf32, #tpu.memory_space<vmem>>, vector<1x128xf32>
    %cst = arith.constant dense<0.000000e+00> : vector<16x128xf32>
    %3 = tpu.matmul %0, %1, %cst {dimension_numbers = #tpu.dot_dimension_numbers<[1], [0], [0], [1], [0, 0, 1, 1], [], []>} : vector<16x32xf32>, vector<32x128xf32>, vector<16x128xf32> -> vector<16x128xf32>
    %4 = vector.broadcast %2 : vector<1x128xf32> to vector<16x128xf32>
    %5 = arith.addf %3, %4 : vector<16x128xf32>
    %cst_4 = arith.constant 0.00999999977 : f32
    %6 = vector.broadcast %cst_4 : f32 to vector<16x128xf32>
    %7 = arith.mulf %6, %5 : vector<16x128xf32>
    %8 = arith.maximumf %5, %7 : vector<16x128xf32>
    %c40 = arith.constant 40 : index
    %c0_5 = arith.constant 0 : index
    %9 = vector.load %arg1[%c40, %c0_5] : memref<312x128xf32, #tpu.memory_space<vmem>>, vector<128x128xf32>
    %c168 = arith.constant 168 : index
    %c0_6 = arith.constant 0 : index
    %10 = vector.load %arg1[%c168, %c0_6] : memref<312x128xf32, #tpu.memory_space<vmem>>, vector<1x128xf32>
    %cst_7 = arith.constant dense<0.000000e+00> : vector<16x128xf32>
    %11 = tpu.matmul %8, %9, %cst_7 {dimension_numbers = #tpu.dot_dimension_numbers<[1], [0], [0], [1], [0, 0, 1, 1], [], []>} : vector<16x128xf32>, vector<128x128xf32>, vector<16x128xf32> -> vector<16x128xf32>
    %12 = vector.broadcast %10 : vector<1x128xf32> to vector<16x128xf32>
    %13 = arith.addf %11, %12 : vector<16x128xf32>
    %cst_8 = arith.constant 0.00999999977 : f32
    %14 = vector.broadcast %cst_8 : f32 to vector<16x128xf32>
    %15 = arith.mulf %14, %13 : vector<16x128xf32>
    %16 = arith.maximumf %13, %15 : vector<16x128xf32>
    %c176 = arith.constant 176 : index
    %c0_9 = arith.constant 0 : index
    %17 = vector.load %arg1[%c176, %c0_9] : memref<312x128xf32, #tpu.memory_space<vmem>>, vector<128x128xf32>
    %c304 = arith.constant 304 : index
    %c0_10 = arith.constant 0 : index
    %18 = vector.load %arg1[%c304, %c0_10] : memref<312x128xf32, #tpu.memory_space<vmem>>, vector<1x128xf32>
    %cst_11 = arith.constant dense<0.000000e+00> : vector<16x128xf32>
    %19 = tpu.matmul %16, %17, %cst_11 {dimension_numbers = #tpu.dot_dimension_numbers<[1], [0], [0], [1], [0, 0, 1, 1], [], []>} : vector<16x128xf32>, vector<128x128xf32>, vector<16x128xf32> -> vector<16x128xf32>
    %20 = vector.broadcast %18 : vector<1x128xf32> to vector<16x128xf32>
    %21 = arith.addf %19, %20 : vector<16x128xf32>
    %c0_12 = arith.constant 0 : index
    %c0_13 = arith.constant 0 : index
    %22 = vector.load %arg2[%c0_12, %c0_13] : memref<16x128xf32, #tpu.memory_space<vmem>>, vector<16x128xf32>
    tpu.vector_store %arg2[%c0_12, %c0_13], %21 {strides = array<i32>} : memref<16x128xf32, #tpu.memory_space<vmem>>, vector<16x128xf32>,
    return
  }
}

</mosaic_0001>

<bundles_post_ra>
// kernel: multiclass_classification_forward.1
= control target key start
LH: loop header
LB: loop body
LE: loop exit
PB: predicated region body
PF: predicated region fallthrough
CT: control target
= control target key end

     0   :  { %7 = vsyncpa [#allocation3], 0  ;;  %s643_s0 = inlined_call_operand.hbm [shape: f32[16,32], index: 0, kind: input, shape index: {}]   ;;  %s644_s1 = inlined_call_operand.hbm [shape: f32[312,128], index: 1, kind: input, shape index: {}]   ;;  %s645_s2 = inlined_call_operand.vmem [shape: f32[16,128], index: 2, kind: output, shape index: {}]  }
   0x1   :  { %8 = vsyncpa [#allocation5], 0  ;;  %s592_s9 = smov [#allocation2]   ;;  %s544_s13 = scalar_lea.hbm %s643_s0, 256 }
   0x2   :  { %s14_s10 = sshll.u32 %s592_s9, 4  ;;  %p545_p0 = scmp.ne.s32.totalorder %s643_s0, %s544_s13  ;;  %s15_s10 = int_to_ptr.vmem [resolvable:$true] %s14_s10 }
   0x3   :  { %p548_p1 = scmp.lt.u32.totalorder %s544_s13, %s643_s0 }
   0x5   :  { %p550_p2 = pnand %p548_p1, %p545_p0 }
   0x7   :  { %553 = shalt.err (!%p550_p2)
}
   0x8   :  { %s554_s18 = scalar_lea.vmem %s15_s10, 256  ;;  %p559_p4 = scmp.lt.s32.totalorder %s15_s10, %s15_s10 }
   0x9   :  { %p555_p3 = scmp.ne.s32.totalorder %s15_s10, %s554_s18  ;;  %p560_p5 = scmp.lt.s32.totalorder %s554_s18, %s554_s18 }
   0xb   :  { %p561_p6 = por %p560_p5, %p559_p4 }
   0xd   :  { %p562_p7 = pnand %p561_p6, %p555_p3 }
   0xf   :  { %565 = shalt.err (!%p562_p7)
}
  0x10   :  { %s593_s19 = smov 128   ;;  %s594_s20 = smov 8  }
  0x11   :  { %20 = dma.hbm_to_vmem [thread:$0]  %s643_s0, 256, %s15_s10, [#allocation3], %s593_s19, %s593_s19, %s594_s20  }
  0x12   :  { %s595_s23 = smov [#allocation4]   ;;  %s566_s27 = scalar_lea.hbm %s644_s1, 4992 }
  0x13   :  { %s26_s24 = sshll.u32 %s595_s23, 4  ;;  %p567_p8 = scmp.ne.s32.totalorder %s644_s1, %s566_s27  ;;  %s27_s24 = int_to_ptr.vmem [resolvable:$true] %s26_s24 }
  0x14   :  { %p570_p9 = scmp.lt.u32.totalorder %s566_s27, %s644_s1 }
  0x16   :  { %p572_p10 = pnand %p570_p9, %p567_p8 }
  0x18   :  { %575 = shalt.err (!%p572_p10)
}
  0x19   :  { %s576_s4 = scalar_lea.vmem %s27_s24, 4992  ;;  %p581_p12 = scmp.lt.s32.totalorder %s27_s24, %s27_s24 }
  0x1a   :  { %p577_p11 = scmp.ne.s32.totalorder %s27_s24, %s576_s4  ;;  %p582_p13 = scmp.lt.s32.totalorder %s576_s4, %s576_s4 }
  0x1c   :  { %p583_p0 = por %p582_p13, %p581_p12 }
  0x1e   :  { %p584_p1 = pnand %p583_p0, %p577_p11 }
  0x20   :  { %587 = shalt.err (!%p584_p1)
}
  0x21   :  { %32 = dma.hbm_to_vmem [thread:$0]  %s644_s1, 4992, %s27_s24, [#allocation5], %s593_s19, %s593_s19, %s594_s20  }
  0x22   :  { %588 = dma.done.wait [#allocation3], 256  }
  0x23   :  { %589 = vsyncadd [#allocation3], 4294967040 }
  0x24   :  { %590 = dma.done.wait [#allocation5], 4992  }
  0x25   :  { %591 = vsyncadd [#allocation5], 4294962304  ;;  %vm50_vm0 = vcmask 261120   ;;  %v41_v0 = vld [vmem:[#allocation4] sm:$0xff]  ;;  %v42_v1 = vld [vmem:[#allocation4 + $0x8] sm:$0xff] }
  0x26   :  { %v43_v2 = vld [vmem:[#allocation4 + $0x10] sm:$0xff]  ;;  %v468_v3 = vpack.c.bf16 %v42_v1, %v41_v0  ;;  %v44_v4 = vld [vmem:[#allocation4 + $0x18] sm:$0xff]  ;;  %v136_v7 = vld [vmem:[#allocation4 + $0x28] sm:$0xff] }
  0x27   :  { %v39_v5 = vld [vmem:[#allocation2] sm:$0xff]  ;;  %v472_v6 = vpack.c.bf16 %v44_v4, %v43_v2  ;;  %v138_v9 = vld [vmem:[#allocation4 + $0x38] sm:$0xff]  ;;  %v139_v11 = vld [vmem:[#allocation4 + $0x40] sm:$0xff] }
  0x28   :  { %395 = vmatprep.mubr.msk.f32.mxu0 %vm50_vm0, %v39_v5  ;;  %v137_v8 = vld [vmem:[#allocation4 + $0x30] sm:$0xff]  ;;  %469 = vmatprep.subr.bf16.mxu0 %v468_v3  ;;  %v480_v12 = vpack.c.bf16 %v139_v11, %v138_v9  ;;  %v140_v13 = vld [vmem:[#allocation4 + $0x48] sm:$0xff]  ;;  %v40_v16 = vld [vmem:[#allocation2 + $0x8] sm:$0xff] }
  0x29   :  { %v476_v10 = vpack.c.bf16 %v137_v8, %v136_v7  ;;  %471 = vmatpush3.bf16.msra.mxu0 %v468_v3  ;;  %v141_v14 = vld [vmem:[#allocation4 + $0x50] sm:$0xff]  ;;  %v142_v17 = vld [vmem:[#allocation4 + $0x58] sm:$0xff]  ;;  %v143_v18 = vld [vmem:[#allocation4 + $0x60] sm:$0xff] }
  0x2a   :  { %473 = vmatprep.subr.bf16.mxu0 %v472_v6  ;;  %v484_v15 = vpack.c.bf16 %v141_v14, %v140_v13  ;;  %v488_v19 = vpack.c.bf16 %v143_v18, %v142_v17  ;;  %v144_v20 = vld [vmem:[#allocation4 + $0x68] sm:$0xff]  ;;  %v145_v21 = vld [vmem:[#allocation4 + $0x70] sm:$0xff]  ;;  %v146_v23 = vld [vmem:[#allocation4 + $0x78] sm:$0xff] }
  0x2b   :  { %477 = vmatprep.subr.bf16.mxu1 %v476_v10  ;;  %v492_v22 = vpack.c.bf16 %v145_v21, %v144_v20  ;;  %v147_v24 = vld [vmem:[#allocation4 + $0x80] sm:$0xff]  ;;  %v148_v26 = vld [vmem:[#allocation4 + $0x88] sm:$0xff]  ;;  %v149_v27 = vld [vmem:[#allocation4 + $0x90] sm:$0xff] }
  0x2c   :  { %479 = vmatpush3.bf16.msra.mxu1 %v476_v10  ;;  %v496_v25 = vpack.c.bf16 %v147_v24, %v146_v23  ;;  %v500_v28 = vpack.c.bf16 %v149_v27, %v148_v26  ;;  %v150_v29 = vld [vmem:[#allocation4 + $0x98] sm:$0xff]  ;;  %v151_v30 = vld [vmem:[#allocation4 + $0xa0] sm:$0xff]  ;;  %v236_v32 = vld [vmem:[#allocation4 + $0xb0] sm:$0xff] }
  0x2d   :  { %481 = vmatprep.subr.bf16.mxu1 %v480_v12  ;;  %475 = vmatpush3.bf16.msra.mxu0 %v472_v6  ;;  %v504_v31 = vpack.c.bf16 %v151_v30, %v150_v29  ;;  %v237_v33 = vld [vmem:[#allocation4 + $0xb8] sm:$0xff]  ;;  %v238_v34 = vld [vmem:[#allocation4 + $0xc0] sm:$0xff]  ;;  %v239_v36 = vld [vmem:[#allocation4 + $0xc8] sm:$0xff] }
  0x2e   :  { %v508_v35 = vpack.c.bf16 %v237_v33, %v236_v32  ;;  %v512_v37 = vpack.c.bf16 %v239_v36, %v238_v34  ;;  %v240_v38 = vld [vmem:[#allocation4 + $0xd0] sm:$0xff]  ;;  %v241_v39 = vld [vmem:[#allocation4 + $0xd8] sm:$0xff]  ;;  %v242_v41 = vld [vmem:[#allocation4 + $0xe0] sm:$0xff] }
  0x2f   :  { %v516_v40 = vpack.c.bf16 %v241_v39, %v240_v38  ;;  %v243_v42 = vld [vmem:[#allocation4 + $0xe8] sm:$0xff]  ;;  %v244_v44 = vld [vmem:[#allocation4 + $0xf0] sm:$0xff]  ;;  %v245_v45 = vld [vmem:[#allocation4 + $0xf8] sm:$0xff] }
  0x30   :  { %483 = vmatpush3.bf16.msra.mxu1 %v480_v12  ;;  %396 = vmatmul.mubr.msk.f32.vlgmr.msra.gmra.mrb[0].mxu0 %vm50_vm0, %v40_v16  ;;  %v520_v43 = vpack.c.bf16 %v243_v42, %v242_v41  ;;  %v524_v46 = vpack.c.bf16 %v245_v45, %v244_v44  ;;  %v246_v47 = vld [vmem:[#allocation4 + $0x100] sm:$0xff]  ;;  %v247_v48 = vld [vmem:[#allocation4 + $0x108] sm:$0xff]  ;;  %v248_v59 = vld [vmem:[#allocation4 + $0x110] sm:$0xff] }
  0x31   :  { %485 = vmatprep.subr.bf16.mxu1 %v484_v15  ;;  %509 = vmatprep.subr.bf16.mxu0 %v508_v35  ;;  %v528_v49 = vpack.c.bf16 %v247_v48, %v246_v47  ;;  %v340_v50 = vld [vmem:[#allocation4 + $0x20] ss:$0 sm:$0xff]  ;;  %v249_v60 = vld [vmem:[#allocation4 + $0x118] sm:$0xff]  ;;  %v251_v63 = vld [vmem:[#allocation4 + $0x128] sm:$0xff] }
  0x32   :  { %511 = vmatpush3.bf16.msra.mxu0 %v508_v35  ;;  %v532_v61 = vpack.c.bf16 %v249_v60, %v248_v59  ;;  %v250_v62 = vld [vmem:[#allocation4 + $0x120] sm:$0xff]  ;;  %v343_v1 = vld [vmem:[#allocation4 + $0xa8] ss:$0 sm:$0xff]  ;;  %v344_v10 = vld [vmem:[#allocation4 + $0x130] ss:$0 sm:$0xff] }
  0x33   :  { %513 = vmatprep.subr.bf16.mxu0 %v512_v37  ;;  %v536_v0 = vpack.c.bf16 %v251_v63, %v250_v62 }
  0x34   :  { %487 = vmatpush3.bf16.msra.mxu1 %v484_v15 }
  0x35   :  { %489 = vmatprep.subr.bf16.mxu1 %v488_v19 }
  0x36   :  { %515 = vmatpush3.bf16.msra.mxu0 %v512_v37 }
  0x37   :  { %517 = vmatprep.subr.bf16.mxu0 %v516_v40 }
  0x38   :  { %491 = vmatpush3.bf16.msra.mxu1 %v488_v19 }
  0x39   :  { %493 = vmatprep.subr.bf16.mxu1 %v492_v22 }
  0x3a   :  { %519 = vmatpush3.bf16.msra.mxu0 %v516_v40 }
  0x3b   :  { %521 = vmatprep.subr.bf16.mxu0 %v520_v43 }
  0x3c   :  { %495 = vmatpush3.bf16.msra.mxu1 %v492_v22 }
  0x3d   :  { %497 = vmatprep.subr.bf16.mxu1 %v496_v25 }
  0x3e   :  { %523 = vmatpush3.bf16.msra.mxu0 %v520_v43 }
  0x3f   :  { %525 = vmatprep.subr.bf16.mxu0 %v524_v46 }
  0x40   :  { %499 = vmatpush3.bf16.msra.mxu1 %v496_v25 }
  0x41   :  { %501 = vmatprep.subr.bf16.mxu1 %v500_v28 }
  0x42   :  { %527 = vmatpush3.bf16.msra.mxu0 %v524_v46 }
  0x43   :  { %529 = vmatprep.subr.bf16.mxu0 %v528_v49 }
  0x44   :  { %503 = vmatpush3.bf16.msra.mxu1 %v500_v28 }
  0x45   :  { %505 = vmatprep.subr.bf16.mxu1 %v504_v31 }
  0x46   :  { %531 = vmatpush3.bf16.msra.mxu0 %v528_v49 }
  0x47   :  { %533 = vmatprep.subr.bf16.mxu0 %v532_v61 }
  0x48   :  { %507 = vmatpush3.bf16.msra.mxu1 %v504_v31 }
  0x4a   :  { %535 = vmatpush3.bf16.msra.mxu0 %v532_v61 }
  0x4b   :  { %537 = vmatprep.subr.bf16.mxu0 %v536_v0 }
  0x4e   :  { %539 = vmatpush3.bf16.msra.mxu0 %v536_v0 }
 0x103   :  { %v397_v51 = vpop.f32.mrb[0].mxu0 }
 0x104   :  { %v129_v52 = vadd.f32 %v397_v51, %v340_v50  ;;  %v123_v53 = vpop.f32.mrb[1].mxu0 }
 0x105   :  { %v124_v54 = vadd.f32 %v340_v50, %v123_v53 }
 0x106   :  { %v133_v55 = vmul.f32 0.01, %v129_v52 }
 0x107   :  { %v132_v56 = vmul.f32 0.01, %v124_v54 }
 0x108   :  { %v135_v58 = vmax.f32 %v129_v52, %v133_v55 }
 0x109   :  { %v134_v57 = vmax.f32 %v124_v54, %v132_v56 }
 0x10b   :  { %430 = vmatprep.mubr.f32.mxu1 %v134_v57 }
 0x10c   :  { %431 = vmatmul.mubr.f32.vlgmr.msra.gmra.mrb[0].mxu1 %v135_v58 }
 0x1df   :  { %v432_v2 = vpop.f32.mrb[0].mxu1 }
 0x1e0   :  { %v229_v3 = vadd.f32 %v432_v2, %v343_v1  ;;  %v223_v4 = vpop.f32.mrb[1].mxu1 }
 0x1e1   :  { %v224_v5 = vadd.f32 %v343_v1, %v223_v4 }
 0x1e2   :  { %v233_v6 = vmul.f32 0.01, %v229_v3 }
 0x1e3   :  { %v232_v7 = vmul.f32 0.01, %v224_v5 }
 0x1e4   :  { %v235_v9 = vmax.f32 %v229_v3, %v233_v6 }
 0x1e5   :  { %v234_v8 = vmax.f32 %v224_v5, %v232_v7 }
 0x1e7   :  { %465 = vmatprep.mubr.f32.mxu0 %v234_v8 }
 0x1e8   :  { %466 = vmatmul.mubr.f32.vlgmr.msra.gmra.mrb[2].mxu0 %v235_v9 }
 0x2bb   :  { %v467_v11 = vpop.f32.mrb[2].mxu0 }
 0x2bc   :  { %v329_v12 = vadd.f32 %v467_v11, %v344_v10  ;;  %v323_v13 = vpop.f32.mrb[3].mxu0 }
 0x2bd   :  { %v324_v14 = vadd.f32 %v344_v10, %v323_v13 }
 0x2be   :  { %333 = vst [vmem:[%s645_s2 + $0x8] sm:$0xff] %v329_v12 }
 0x2bf   :  { %332 = vst [vmem:[%s645_s2] sm:$0xff] %v324_v14 }
 0x2c0   :  { %338 = vsyncpa [#allocation3], 1 }
 0x2c1   :  { %339 = vsyncpa [#allocation5], 1 }

</bundles_post_ra>
